<compile_context>
chip_gen: v5e
topology: v5e:2x2
jax: 0.10.0
libtpu: 0.0.40
codegen_flags: <defaults>
</compile_context>

<pallas_src>
import jax
import jax.numpy as jnp
from jax.experimental import pallas as pl
from jax.experimental.pallas import tpu as pltpu


def _linear_sub_relu_kernel(w_ref, b_ref, x_ref, o_ref):
    # All refs live in SMEM; every read/write below is a cheap scalar op.
    w0 = w_ref[0, 0]
    w1 = w_ref[0, 1]
    b = b_ref[0]
    x0 = x_ref[0, 0]
    x1 = x_ref[0, 1]

    # v1 = x @ W.T + b  (K=2 contraction as two scalar multiply-adds).
    v1 = x0 * w0 + x1 * w1 + b

    # out = relu(v1 - x), broadcast of the single output feature over F=2.
    d0 = v1 - x0
    d1 = v1 - x1
    zero = jnp.float32(0.0)
    o_ref[0, 0] = jnp.where(d0 > zero, d0, zero)
    o_ref[0, 1] = jnp.where(d1 > zero, d1, zero)


def linear_sub_relu(x, w, b):
    """relu(x @ w.T + b - x) for x:(1,2), w:(1,2), b:(1,), all float32."""
    B, F = x.shape
    assert (B, F) == (1, 2), "scalar-path kernel is specialized to Linear(2,1)"
    # No astype in the hot path: require f32 up front instead of silently
    # downcasting higher-precision weights.
    for name, a in (("x", x), ("w", w), ("b", b)):
        if a.dtype != jnp.float32:
            raise TypeError(f"{name} must be float32, got {a.dtype}")

    smem = pl.BlockSpec(memory_space=pltpu.MemorySpace.SMEM)
    return pl.pallas_call(
        _linear_sub_relu_kernel,
        out_shape=jax.ShapeDtypeStruct((B, F), jnp.float32),
        in_specs=[smem, smem, smem],   # w, b, x -- all scalar-path
        out_specs=smem,                # (1,2) output written as two scalars
    )(w, b, x)


if __name__ == "__main__":
    key = jax.random.PRNGKey(0)
    kx, kw, kb = jax.random.split(key, 3)

    # Input: x1 ~ (1, 2), matching `x1 = torch.randn(1, 2)` in the module.
    x1 = jax.random.normal(kx, (1, 2), dtype=jnp.float32)

    # Deterministic Linear(2, 1) params, emulating PyTorch's default
    # U(-1/sqrt(in_features), 1/sqrt(in_features)) init.
    bound = 2.0 ** -0.5
    W = jax.random.uniform(kw, (1, 2), jnp.float32, minval=-bound, maxval=bound)
    bias = jax.random.uniform(kb, (1,), jnp.float32, minval=-bound, maxval=bound)

    out = linear_sub_relu(x1, W, bias)
    jax.block_until_ready(out)

    # Pure-JAX reference check (same math as the PyTorch forward).
    ref = jnp.maximum((x1 @ W.T + bias[None, :]) - x1, 0.0)
    assert out.shape == (1, 2)
    assert jnp.allclose(out, ref, atol=1e-6), (out, ref)

    print("KERNEL_OK")
</pallas_src>

<mosaic_0001>
module attributes {stable_mosaic.version = 11 : i64} {
  func.func @_linear_sub_relu_kernel(%arg0: memref<1x2xf32, #tpu.memory_space<smem>>, %arg1: memref<1xf32, #tpu.memory_space<smem>>, %arg2: memref<1x2xf32, #tpu.memory_space<smem>>, %arg3: memref<1x2xf32, #tpu.memory_space<smem>>) attributes {dimension_semantics = [], scalar_prefetch = 0 : i64, scratch_operands = 0 : i64, tpu.core_type = #tpu.core_type<tc>} {
    %c0 = arith.constant 0 : index
    %c0_0 = arith.constant 0 : index
    %0 = memref.load %arg0[%c0, %c0_0] : memref<1x2xf32, #tpu.memory_space<smem>>
    %c0_1 = arith.constant 0 : index
    %c1 = arith.constant 1 : index
    %1 = memref.load %arg0[%c0_1, %c1] : memref<1x2xf32, #tpu.memory_space<smem>>
    %c0_2 = arith.constant 0 : index
    %2 = memref.load %arg1[%c0_2] : memref<1xf32, #tpu.memory_space<smem>>
    %c0_3 = arith.constant 0 : index
    %c0_4 = arith.constant 0 : index
    %3 = memref.load %arg2[%c0_3, %c0_4] : memref<1x2xf32, #tpu.memory_space<smem>>
    %c0_5 = arith.constant 0 : index
    %c1_6 = arith.constant 1 : index
    %4 = memref.load %arg2[%c0_5, %c1_6] : memref<1x2xf32, #tpu.memory_space<smem>>
    %5 = arith.mulf %3, %0 : f32
    %6 = arith.mulf %4, %1 : f32
    %7 = arith.addf %5, %6 : f32
    %8 = arith.addf %7, %2 : f32
    %9 = arith.subf %8, %3 : f32
    %10 = arith.subf %8, %4 : f32
    %cst = arith.constant 0.000000e+00 : f32
    %11 = arith.cmpf ogt, %9, %cst : f32
    %cst_7 = arith.constant 0.000000e+00 : f32
    %12 = arith.select %11, %9, %cst_7 : f32
    %c0_8 = arith.constant 0 : index
    %c0_9 = arith.constant 0 : index
    %13 = memref.load %arg3[%c0_8, %c0_9] : memref<1x2xf32, #tpu.memory_space<smem>>
    memref.store %12, %arg3[%c0_8, %c0_9] : memref<1x2xf32, #tpu.memory_space<smem>>
    %cst_10 = arith.constant 0.000000e+00 : f32
    %14 = arith.cmpf ogt, %10, %cst_10 : f32
    %cst_11 = arith.constant 0.000000e+00 : f32
    %15 = arith.select %14, %10, %cst_11 : f32
    %c0_12 = arith.constant 0 : index
    %c1_13 = arith.constant 1 : index
    %16 = memref.load %arg3[%c0_12, %c1_13] : memref<1x2xf32, #tpu.memory_space<smem>>
    memref.store %15, %arg3[%c0_12, %c1_13] : memref<1x2xf32, #tpu.memory_space<smem>>
    return
  }
}

</mosaic_0001>

<bundles_post_ra>
// kernel: tpu_custom_call.1
= control target key start
LH: loop header
LB: loop body
LE: loop exit
PB: predicated region body
PF: predicated region fallthrough
CT: control target
= control target key end

     0   :  { %9 = vsyncpa [#allocation5], 0  ;;  %s159_s0 = inlined_call_operand.vmem [shape: f32[1,2], index: 0, kind: input, shape index: {}]   ;;  %s160_s1 = inlined_call_operand.<no memory space> [shape: f32[1], index: 1, kind: input, shape index: {}]   ;;  %s161_s2 = inlined_call_operand.vmem [shape: f32[1,2], index: 2, kind: input, shape index: {}]   ;;  %s162_s3 = inlined_call_operand.hbm [shape: f32[1,2], index: 3, kind: output, shape index: {}]  }
   0x1   :  { %10 = vsyncpa [#allocation7], 0 }
   0x2   :  { %11 = vsyncpa [#allocation4], 0  ;;  %s17_s14 = sshll.u32 %s159_s0, 4  ;;  %s28_s17 = sshll.u32 %s161_s2, 4  ;;  %s18_s14 = int_to_ptr.vmem [resolvable:$true] %s17_s14  ;;  %s29_s17 = int_to_ptr.vmem [resolvable:$true] %s28_s17 }
   0x3   :  { %s124_s18 = smov [#allocation3]   ;;  %s125_s19 = smov [#allocation6]  }
   0x4   :  { %20 = dma.vmem_to_smem %s18_s14, 16, %s124_s18, [#allocation5]  }
   0x5   :  { %31 = dma.vmem_to_smem %s29_s17, 16, %s125_s19, [#allocation7]  }
   0x6   :  { %118 = dma.done.wait [#allocation5], 16  }
   0x7   :  { %119 = vsyncadd [#allocation5], 4294967280 }
   0x8   :  { %120 = dma.done.wait [#allocation7], 16  }
   0x9   :  { %121 = vsyncadd [#allocation7], 4294967280 }
   0xa   :  { %40 = sfence }
   0xb   :  { %s41_s20 = sld [smem:[#allocation3]]  ;;  %s65_s30 = sshll.u32 %s162_s3, 4  ;;  %s66_s30 = int_to_ptr.hbm [resolvable:$true] %s65_s30 }
   0xc   :  { %s77_s21 = sld [smem:[#allocation3 + $0x1]]  ;;  %s126_s6 = smov [#allocation8]  }
   0xd   :  { %s44_s22 = sld [smem:[#allocation6]] }
   0xe   :  { %s78_s23 = sld [smem:[#allocation6 + $0x1]] }
  0x13   :  { %s46_s0 = smul.f32 %s44_s22, %s41_s20 }
  0x14   :  { %s47_s24 = smul.f32 %s78_s23, %s77_s21 }
  0x16   :  { %s48_s25 = sadd.f32 %s47_s24, %s46_s0 }
  0x18   :  { %s49_s2 = sadd.f32 %s48_s25, %s160_s1 }
  0x1a   :  { %s50_s4 = ssub.f32 %s49_s2, %s44_s22 }
  0x1b   :  { %s51_s5 = ssub.f32 %s49_s2, %s78_s23 }
  0x1c   :  { %p52_p0 = scmp.gt.f32.partialorder %s50_s4, 0.0 }
  0x1d   :  { %p56_p1 = scmp.gt.f32.partialorder %s51_s5, 0.0 }
  0x1e   :  { %s164_s4 = smov (!%p52_p0, %s50_s4), 0.0 }
  0x1f   :  { %s166_s5 = smov (!%p56_p1, %s51_s5), 0.0  ;;  %55 = sst [smem:[#allocation8]] %s164_s4 }
  0x20   :  { %59 = sst [smem:[#allocation8 + $0x1]] %s166_s5 }
  0x21   :  { %68 = dma.smem_to_hbm %s126_s6, 16, %s66_s30, [#allocation4]  }
  0x22   :  { %122 = dma.done.wait [#allocation4], 16  }
  0x23   :  { %123 = vsyncadd [#allocation4], 4294967280 }
  0x24   :  { %73 = sfence }
  0x25   :  { %74 = vsyncpa [#allocation4], 1 }
  0x26   :  { %75 = vsyncpa [#allocation5], 1 }
  0x27   :  { %76 = vsyncpa [#allocation7], 1 }

</bundles_post_ra>
